<compile_context>
chip_gen: v7x
topology: tpu7x:2x2x1
jax: 0.10.0
libtpu: 0.0.40
codegen_flags: <defaults>
</compile_context>

<pallas_src>
import jax
import jax.numpy as jnp
from jax.experimental import pallas as pl
from jax.experimental.pallas import tpu as pltpu


def _broadcast_row_kernel(row_ref, o_ref):
    # row_ref: [1, W] parameter row, resident in VMEM across the whole grid.
    # o_ref:   [TR, W] output tile.  Pure sublane-broadcast + store; the output
    # DMA to HBM is the only binding resource.
    o_ref[...] = jnp.broadcast_to(row_ref[...], o_ref.shape)


def _pick_tile_rows(total_rows, row_bytes, target_tile_bytes=4 << 20):
    """Largest multiple-of-8 row tile <= ~target bytes, kept splittable across TCs."""
    by_bytes = max(8, (target_tile_bytes // max(row_bytes, 1)) // 8 * 8)
    tr = min(total_rows, by_bytes)
    if tr >= total_rows:
        if total_rows >= 16:
            # Whole array would fit in one tile: split in two so the "parallel"
            # grid axis can be sharded across both v7x TensorCores.
            tr = pl.cdiv(pl.cdiv(total_rows, 2), 8) * 8
        else:
            # Single small block; block_shape == full array dim escapes (8,128).
            return total_rows
    else:
        tr = max(8, (tr // 8) * 8)
    return min(tr, total_rows)


def _broadcast_rows_pallas(row, total_rows, out_dtype):
    """Write `total_rows` copies of `row` ([W]) as a [total_rows, W] array."""
    W = row.shape[-1]
    row2d = row.reshape(1, W)
    itemsize = jnp.dtype(out_dtype).itemsize
    row_bytes = W * itemsize
    tr = _pick_tile_rows(total_rows, row_bytes)
    grid = (pl.cdiv(total_rows, tr),)

    return pl.pallas_call(
        _broadcast_row_kernel,
        out_shape=jax.ShapeDtypeStruct((total_rows, W), out_dtype),
        grid=grid,
        in_specs=[
            # Same block every grid step -> parameter row stays resident in VMEM.
            pl.BlockSpec((1, W), lambda i: (0, 0)),
        ],
        out_specs=pl.BlockSpec((tr, W), lambda i: (i, 0)),
        compiler_params=pltpu.CompilerParams(
            dimension_semantics=("parallel",),
        ),
        # Pure-bandwidth op: tell XLA so it can schedule/overlap around it.
        cost_estimate=pl.CostEstimate(
            flops=0,
            transcendentals=0,
            bytes_accessed=int(total_rows) * int(row_bytes) + int(row_bytes),
        ),
    )(row2d)


def toy_encoder_vb_forward(x, var_mean, log_var_z, *, force_pallas=False,
                           pallas_min_bytes=1 << 20):
    """Pallas implementation of ToyEncoder_VB.forward.

    x:          [B, ...]  (only the batch dimension is used; values are ignored)
    var_mean:   [d]
    log_var_z:  [d]
    returns:    [B, 2*d]
    """
    B = x.shape[0]
    d = var_mean.shape[0]
    two_d = 2 * d

    # Match torch promotion: ol is float32 ones, so output promotes with f32.
    out_dtype = jnp.result_type(var_mean.dtype, log_var_z.dtype, jnp.float32)
    row = jnp.concatenate(
        [var_mean.astype(out_dtype).reshape(d),
         log_var_z.astype(out_dtype).reshape(d)], axis=0)  # [2d]

    itemsize = jnp.dtype(out_dtype).itemsize
    total_bytes = B * two_d * itemsize

    # Tiny problems: custom-call launch / grid setup dominates; a plain XLA
    # broadcast already hits the HBM roofline.
    if total_bytes < pallas_min_bytes and not force_pallas:
        return jnp.broadcast_to(row[None, :], (B, two_d))

    if two_d % 128 == 0:
        # Output rows are already lane-dense; tile directly over the batch.
        return _broadcast_rows_pallas(row, B, out_dtype)

    if 128 % two_d == 0 and (B * two_d) % 128 == 0:
        # Narrow output (2d < 128): flatten to a lane-dense [B*2d/128, 128] slab
        # so every vreg store is a full, unmasked vst.  The 128-lane pattern is
        # the row repeated 128/2d times; reshaping back is free (same bytes).
        pattern = jnp.tile(row, 128 // two_d)                # [128]
        flat = _broadcast_rows_pallas(pattern, (B * two_d) // 128, out_dtype)
        return flat.reshape(B, two_d)

    # Ragged fallback (2d neither a multiple nor a divisor of 128): masked
    # partial stores, but correct for any shape.
    return _broadcast_rows_pallas(row, B, out_dtype)


if __name__ == "__main__":
    key = jax.random.PRNGKey(0)
    kx, kvm, klv = jax.random.split(key, 3)

    def reference(x, vm, lv):
        B = x.shape[0]
        d = vm.shape[0]
        ol = jnp.ones((B, d), jnp.float32)
        return jnp.concatenate([vm * ol, lv * ol], axis=1)

    def check(B, d, force_pallas):
        kk = jax.random.fold_in(key, B * 1000 + d)
        kxx, kv, kl = jax.random.split(kk, 3)
        x = jax.random.normal(kxx, (B, d), dtype=jnp.float32)
        vm = jax.random.normal(kv, (d,), dtype=jnp.float32)
        lv = jax.random.normal(kl, (d,), dtype=jnp.float32)
        y = jax.block_until_ready(
            toy_encoder_vb_forward(x, vm, lv, force_pallas=force_pallas))
        ref = reference(x, vm, lv)
        assert y.shape == (B, 2 * d), (y.shape, (B, 2 * d))
        assert y.dtype == ref.dtype, (y.dtype, ref.dtype)
        assert jnp.allclose(y, ref, atol=1e-6, rtol=1e-6), (B, d)

    # Toy spec size (module default): plain-XLA fast path for sub-1MiB outputs.
    check(2, 32, force_pallas=False)
    # Lane-dense flattened Pallas path (2d = 64 < 128, B*2d % 128 == 0).
    check(256, 32, force_pallas=True)
    # Direct Pallas path (2d = 128, already a multiple of 128 lanes).
    check(64, 64, force_pallas=True)
    # Ragged fallback Pallas path (2d = 96 neither divides nor is a multiple of 128).
    check(10, 48, force_pallas=True)

    # Exact torch parameter initialization (zeros) through the Pallas path.
    x0 = jax.random.normal(kx, (2, 32), dtype=jnp.float32)
    y0 = jax.block_until_ready(
        toy_encoder_vb_forward(x0, jnp.zeros((32,), jnp.float32),
                               jnp.zeros((32,), jnp.float32), force_pallas=True))
    assert y0.shape == (2, 64)
    assert jnp.allclose(y0, jnp.zeros((2, 64), jnp.float32))

    print("KERNEL_OK")
</pallas_src>

<mosaic_0001>
module attributes {stable_mosaic.version = 11 : i64} {
  func.func @_broadcast_row_kernel(%arg0: i32, %arg1: memref<1x128xf32, #tpu.memory_space<vmem>>, %arg2: memref<64x128xf32, #tpu.memory_space<vmem>>) attributes {dimension_semantics = [#tpu.dimension_semantics<parallel>], iteration_bounds = array<i64: 2>, scalar_prefetch = 0 : i64, scratch_operands = 0 : i64, tpu.core_type = #tpu.core_type<tc>, window_params = [{pipeline_mode = #tpu.pipeline_mode<synchronous>, transform_indices = @transform_0, window_bounds = array<i64: 1, 128>}, {transform_indices = @transform_1, window_bounds = array<i64: 64, 128>}]} {
    %c0 = arith.constant 0 : index
    %c0_0 = arith.constant 0 : index
    %0 = vector.load %arg1[%c0, %c0_0] : memref<1x128xf32, #tpu.memory_space<vmem>>, vector<1x128xf32>
    %1 = vector.shape_cast %0 : vector<1x128xf32> to vector<1x128xf32>
    %2 = vector.broadcast %1 : vector<1x128xf32> to vector<64x128xf32>
    %c0_1 = arith.constant 0 : index
    %c0_2 = arith.constant 0 : index
    %3 = vector.load %arg2[%c0_1, %c0_2] : memref<64x128xf32, #tpu.memory_space<vmem>>, vector<64x128xf32>
    tpu.vector_store %arg2[%c0_1, %c0_2], %2 {strides = array<i32>} : memref<64x128xf32, #tpu.memory_space<vmem>>, vector<64x128xf32>,
    return
  }
  func.func @transform_0(%arg0: i32) -> (i32, i32) {
    %c0_i32 = arith.constant 0 : i32
    %c0_i32_0 = arith.constant 0 : i32
    %c0_i32_1 = arith.constant 0 : i32
    return %c0_i32, %c0_i32_0 : i32, i32
  }
  func.func @transform_1(%arg0: i32) -> (i32, i32) {
    %c0_i32 = arith.constant 0 : i32
    %c0_i32_0 = arith.constant 0 : i32
    return %arg0, %c0_i32 : i32, i32
  }
}

</mosaic_0001>

<bundles_post_ra>
// kernel: tpu_custom_call.1
= control target key start
LH: loop header
LB: loop body
LE: loop exit
PB: predicated region body
PF: predicated region fallthrough
CT: control target
= control target key end

     0   :  { %6 = vsyncpa [#allocation3], 0  ;;  %s508_s0 = inlined_call_operand.hbm [shape: f32[1,128], index: 0, kind: input, shape index: {}]   ;;  %s509_s1 = inlined_call_operand.hbm [shape: f32[128,128], index: 1, kind: output, shape index: {}]  }
   0x1   :  { %7 = vsyncpa [#allocation4], 0 }
   0x2   :  { %9 = vsyncpa [#allocation4 + $0x1], 0  ;;  %s375_s6 = smov 0   ;;  %s377_s7 = smov 0  }
   0x3   :  { %s379_s8 = smov 0   ;;  %s381_s9 = smov 0  }
   0x4 LB: > { %s396_s10 = sadd.s32 4294967295, %s359_s9   ;;  %s200_s11 = sadd.s32 4294967294, %s359_s9   ;;  %s359_s9 = sphi %s381_s9, %s525_s9   ;;  %s355_s8 = sphi %s379_s8, %s524_s8   ;;  %s351_s7 = sphi %s377_s7, %s523_s7   ;;  %s347_s6 = sphi %s375_s6, %s522_s6  }
   0x5   : > { %s400_s12 = sadd.s32 1, %s359_s9   ;;  %s43_s13 = sadd.s32 1, %s355_s8 }
   0x6   : > { %s40_s14 = ssub.s32 %s359_s9, %s400_s12  ;;  %p53_p0 = scmp.ne.s32.totalorder %s355_s8, %s351_s7 }
   0x7   : > { %p41_p1 = scmp.eq.s32.totalorder %s40_s14, 0  ;;  %p54_p2 = scmp.eq.s32.totalorder %s396_s10, 1 }
   0x8   : > { %p59_p3 = scmp.ne.s32.totalorder %s351_s7, %s347_s6  ;;  %p60_p4 = scmp.eq.s32.totalorder %s200_s11, 1 }
   0x9   : > { %s411_s15 = scalar_select %p41_p1, %s355_s8, %s43_s13  }
   0xa   : > { %p413_p5 = por %p54_p2, %p53_p0  ;;  %p417_p6 = por %p60_p4, %p59_p3 }
   0xb   : > { %p201_p7 = scmp.ge.s32.totalorder %s359_s9, 1  ;;  %p67_p8 = scmp.lt.s32.totalorder %s359_s9, 3 }
   0xc   : > { %s513_s16 = scalar_select %p413_p5, 1, 0 }
   0xd   : > { %s514_s17 = scalar_select %p417_p6, 1, 0 }
   0xe   : > { %p510_p9 = scmp.eq.s32.totalorder %s396_s10, 0  ;;  %p424_p10 = pnand %p201_p7, %p67_p8 }
   0xf   : > { %s361_s19 = smov [#allocation2]   ;;  %s265_s24 = scalar_lea.hbm %s508_s0, 16 }
  0x10   : > { %s515_s18 = scalar_select %p424_p10, 1, 0 }
  0x11   : > { %s80_s20 = sshll.u32 %s361_s19, 4  ;;  %p219_p11 = pneg %p424_p10  ;;  %s81_s20 = int_to_ptr.vmem [resolvable:$true] %s80_s20 }
  0x12   : > { %p266_p13 = scmp.ne.s32.totalorder %s508_s0, %s265_s24  ;;  %p272_p3 = scmp.lt.u32.totalorder %s265_s24, %s508_s0 }
  0x13   : > { %p432_p12 = pnand %p510_p9, %p219_p11 }
  0x15   : > { %p267_p0 = pneg %p432_p12 }
  0x17   : > { %p268_p1 = pnand %p267_p0, %p266_p13 }
  0x19   : > { %p269_p2 = pneg %p268_p1 }
  0x1b   : > { %p274_p4 = pnand %p272_p3, %p269_p2 }
  0x1d   : > { %277 = shalt.err (!%p274_p4)
}
  0x1e   : > { %s278_s29 = scalar_lea.vmem %s81_s20, 16  ;;  %s285_s30 = scalar_lea.vmem %s81_s20, 32 }
  0x1f   : > { %p279_p7 = scmp.ne.s32.totalorder %s81_s20, %s278_s29  ;;  %p286_p9 = scmp.lt.s32.totalorder %s81_s20, %s81_s20 }
  0x20   : > { %p287_p6 = scmp.lt.s32.totalorder %s285_s30, %s278_s29 }
  0x21   : > { %p281_p8 = pnand %p279_p7, %p267_p0 }
  0x22   : > { %p288_p5 = por %p287_p6, %p286_p9 }
  0x23   : > { %p282_p11 = pneg %p281_p8 }
  0x25   : > { %p289_p10 = pnand %p288_p5, %p282_p11 }
  0x27   : > { %292 = shalt.err (!%p289_p10)
}
  0x28   : > { %222 = dma.hbm_to_vmem [thread:$0]  (!%p432_p12), %s508_s0, 16, %s81_s20, [#allocation3]  }
  0x29   : > { %p517_p13 = scmp.ne.s32.totalorder %s515_s18, 0 }
  0x2a   : > { %p518_p1 = scmp.eq.s32.totalorder (!%p517_p13), %s396_s10, 0 }
  0x2b   : > { %93 = sbr.rel (%p517_p13) target bundleno = 78 (0x4e), region = 24 }
  0x32   : > { %338 = dma.done.wait (%p518_p1), [#allocation3], 16   ;;  %p519_p0 = pmov %p518_p1 }
  0x33   : > { %s105_s4 = sand.u32 1, %s351_s7   ;;  %s212_s11 = sshll.u32 %s396_s10, 10  ;;  %v206_v0 = vld [vmem:[#allocation2] ss:$0 sm:$0xff] }
  0x34   : > { %340 = vsyncadd (%p519_p0), [#allocation3], 4294967280  ;;  %s205_s5 = sshll.u32 %s105_s4, 6  ;;  %s463_s20 = scalar_lea.hbm %s509_s1, %s212_s11 }
  0x35   : > { %s107_s13 = scalar_lea.vmem [#allocation5], %s205_s5  ;;  %s467_s10 = scalar_lea.sflag [#allocation4], %s105_s4 }
  0x36   : > { %s138_s14 = sshll.u32 %s107_s13, 4  ;;  %116 = vst [vmem:[%s107_s13] sm:$0xff] %v206_v0  ;;  %117 = vst [vmem:[%s107_s13 + $0x8] sm:$0xff] %v206_v0  ;;  %p520_p6 = scmp.ne.s32.totalorder %s513_s16, 0  ;;  %s465_s14 = int_to_ptr.vmem [resolvable:$true] %s138_s14 }
  0x37   : > { %118 = vst [vmem:[%s107_s13 + $0x10] sm:$0xff] %v206_v0  ;;  %119 = vst [vmem:[%s107_s13 + $0x18] sm:$0xff] %v206_v0  ;;  %s293_s18 = scalar_lea.vmem %s465_s14, 1024  ;;  %s362_s22 = smov [#allocation5]  }
  0x38   : > { %120 = vst [vmem:[%s107_s13 + $0x20] sm:$0xff] %v206_v0  ;;  %121 = vst [vmem:[%s107_s13 + $0x28] sm:$0xff] %v206_v0  ;;  %p294_p5 = scmp.ne.s32.totalorder %s465_s14, %s293_s18  ;;  %s297_s23 = sshll.u32 %s362_s22, 4  ;;  %s298_s23 = int_to_ptr.vmem [resolvable:$false] %s297_s23 }
  0x39   : > { %122 = vst [vmem:[%s107_s13 + $0x30] sm:$0xff] %v206_v0  ;;  %123 = vst [vmem:[%s107_s13 + $0x38] sm:$0xff] %v206_v0  ;;  %s299_s24 = scalar_lea.vmem %s298_s23, 2048  ;;  %p300_p12 = scmp.lt.s32.totalorder %s465_s14, %s298_s23 }
  0x3a   : > { %p295_p9 = pnand %p294_p5, %p520_p6  ;;  %p301_p2 = scmp.lt.s32.totalorder %s299_s24, %s293_s18 }
  0x3c   : > { %p296_p10 = pneg %p295_p9  ;;  %p302_p3 = por %p301_p2, %p300_p12 }
  0x3e   : > { %p303_p4 = pnand %p302_p3, %p296_p10 }
  0x40   : > { %306 = shalt.err (!%p303_p4)
}
  0x41   : > { %s307_s25 = scalar_lea.hbm %s463_s20, 1024  ;;  %s311_s28 = scalar_lea.hbm %s509_s1, 2048 }
  0x42   : > { %p308_p7 = scmp.ne.s32.totalorder %s463_s20, %s307_s25  ;;  %p312_p13 = scmp.lt.u32.totalorder %s463_s20, %s509_s1 }
  0x43   : > { %p313_p1 = scmp.lt.u32.totalorder %s311_s28, %s307_s25  ;;  %p315_p5 = scmp.lt.u32.totalorder %s307_s25, %s463_s20 }
  0x44   : > { %p309_p8 = pnand %p308_p7, %p520_p6 }
  0x45   : > { %p314_p0 = por %p313_p1, %p312_p13 }
  0x46   : > { %p310_p11 = pneg %p309_p8 }
  0x47   : > { %p316_p9 = por %p315_p5, %p314_p0 }
  0x49   : > { %p317_p10 = pnand %p316_p9, %p310_p11 }
  0x4b   : > { %320 = shalt.err (!%p317_p10)
}
  0x4c   : > { %s363_s2 = smov 128   ;;  %s364_s3 = smov 8  }
  0x4d   : > { %217 = dma.vmem_to_hbm [thread:$0]  (%p520_p6), %s465_s14, 1024, %s463_s20, %s467_s10, %s363_s2, %s363_s2, %s364_s3  }
  0x4e PF: > { %p229_p12 = scmp.ge.s32.totalorder %s359_s9, 2  ;;  %s153_s4 = sand.u32 1, %s347_s6  }
  0x4f   : > { %p521_p2 = scmp.ne.s32.totalorder %s514_s17, 0  ;;  %s154_s5 = scalar_lea.sflag [#allocation4], %s153_s4 }
  0x51   : > { %p224_p3 = pnand %p229_p12, %p521_p2 }
  0x53   : > { %342 = dma.done.wait (!%p224_p3), %s154_s5, 1024  }
  0x54   : > { %344 = vsyncadd (!%p224_p3), %s154_s5, 4294966272  ;;  %p12_p4 = scmp.ge.s32.totalorder %s400_s12, 4   ;;  %s522_s6 = smov %s351_s7 }
  0x55   : > { %s523_s7 = smov %s355_s8  ;;  %s524_s8 = smov %s411_s15 }
  0x56   : > { %s525_s9 = smov %s400_s12  ;;  %14 = sbr.rel (!%p12_p4) target bundleno = 4 (0x4), region = 61 }
  0x5d   :  { %159 = vsyncpa [#allocation3], 1 }
  0x5e   :  { %161 = vsyncpa [#allocation3 + $0x1], 1 }
  0x5f   :  { %162 = vsyncpa [#allocation4], 1 }
  0x60   :  { %164 = vsyncpa [#allocation4 + $0x1], 1 }

</bundles_post_ra>
